<compile_context>
chip_gen: v5e
topology: v5e:2x2
jax: 0.10.0
libtpu: 0.0.40
codegen_flags: <defaults>
</compile_context>

<pallas_src>
import jax
import jax.numpy as jnp
from jax.experimental import pallas as pl
from jax.experimental.pallas import tpu as pltpu


HIDDEN = 64  # fixed by the PyTorch module (nn.Linear(state_dim, 64) -> 64)


def _round_up(a, m):
    return (a + m - 1) // m * m


# ---------------------------------------------------------------------------
# Kernel
# ---------------------------------------------------------------------------
def qnet_kernel(x_ref, w1_ref, w2_ref, wh_ref, o_ref):
    # shared trunk: (x . W1) -> ReLU -> (. W2) -> ReLU, then fused heads.
    # Biases ride in the last row of each weight matrix, driven by the
    # always-1 last lane of the activations. Matmul operands are bf16, the
    # accumulate / bias / ReLU path is f32.
    h1 = jnp.maximum(
        jnp.dot(x_ref[...], w1_ref[...], preferred_element_type=jnp.float32), 0.0
    )
    h2 = jnp.maximum(
        jnp.dot(h1.astype(w2_ref.dtype), w2_ref[...],
                preferred_element_type=jnp.float32), 0.0
    )
    o_ref[...] = jnp.dot(h2.astype(wh_ref.dtype), wh_ref[...],
                         preferred_element_type=jnp.float32)


# ---------------------------------------------------------------------------
# Parameter packing (torch nn.Linear params -> padded, bias-folded matrices)
# ---------------------------------------------------------------------------
def build_padded_params(w1, b1, w2, b2, head_w, head_b,
                        compute_dtype=jnp.bfloat16):
    """Zero-pad all lane dims to 128, fold biases in via the ones-lane trick.

    w1: (state_dim, 64)   b1: (64,) or (1, 64)
    w2: (64, 64)          b2: (64,) or (1, 64)
    head_w: (R, A, 64)    head_b: (R, A)
    """
    state_dim, H = w1.shape
    R, A, _ = head_w.shape
    out_cols = A * R

    IN_PAD = _round_up(state_dim + 1, 128)   # +1 lane reserved for the bias "1"
    H_PAD = _round_up(H + 1, 128)
    OUT_PAD = _round_up(out_cols, 128)

    w1p = jnp.zeros((IN_PAD, H_PAD), jnp.float32)
    w1p = w1p.at[:state_dim, :H].set(w1)
    w1p = w1p.at[IN_PAD - 1, :H].set(jnp.reshape(b1, (-1,)))
    w1p = w1p.at[IN_PAD - 1, H_PAD - 1].set(1.0)   # propagate the ones lane

    w2p = jnp.zeros((H_PAD, H_PAD), jnp.float32)
    w2p = w2p.at[:H, :H].set(w2)
    w2p = w2p.at[H_PAD - 1, :H].set(jnp.reshape(b2, (-1,)))
    w2p = w2p.at[H_PAD - 1, H_PAD - 1].set(1.0)    # propagate the ones lane

    # fuse heads: column a*R + r = head_w[r, a, :]
    wh = jnp.transpose(head_w, (2, 1, 0)).reshape(H, out_cols)
    bh = jnp.transpose(head_b, (1, 0)).reshape(out_cols)
    whp = jnp.zeros((H_PAD, OUT_PAD), jnp.float32)
    whp = whp.at[:H, :out_cols].set(wh)
    whp = whp.at[H_PAD - 1, :out_cols].set(bh)

    return (w1p.astype(compute_dtype),
            w2p.astype(compute_dtype),
            whp.astype(compute_dtype))


# ---------------------------------------------------------------------------
# Wrapper
# ---------------------------------------------------------------------------
def multi_dim_qnetwork_forward(x, padded_params, num_actions, reward_dim,
                               block_rows=1024):
    """x: (B, state_dim) float32 -> (B, num_actions, reward_dim) float32."""
    w1p, w2p, whp = padded_params
    B, state_dim = x.shape
    IN_PAD, H_PAD = w1p.shape
    OUT_PAD = whp.shape[1]
    out_cols = num_actions * reward_dim
    itemsize_in = jnp.dtype(w1p.dtype).itemsize

    # Batch tile: big enough to amortize per-step overhead, capped so tiny
    # batches don't over-pad. Multiple of 128 keeps bf16/f32 sublane tiling
    # happy on every chip.
    TB = max(128, min(block_rows, _round_up(B, 128)))
    B_pad = _round_up(B, TB)

    # Pad x to (B_pad, IN_PAD); last lane is the constant 1 that drives the
    # bias rows folded into the weights. Padded rows/lanes are zero.
    xp = jnp.zeros((B_pad, IN_PAD), jnp.float32)
    xp = xp.at[:B, :state_dim].set(x)
    xp = xp.at[:, IN_PAD - 1].set(1.0)
    xp = xp.astype(w1p.dtype)

    flops = 2 * B_pad * (IN_PAD * H_PAD + H_PAD * H_PAD + H_PAD * OUT_PAD)
    bytes_accessed = (
        B_pad * IN_PAD * itemsize_in
        + (w1p.size + w2p.size + whp.size) * itemsize_in
        + B_pad * OUT_PAD * 4
    )

    out_flat = pl.pallas_call(
        qnet_kernel,
        out_shape=jax.ShapeDtypeStruct((B_pad, OUT_PAD), jnp.float32),
        grid=(B_pad // TB,),
        in_specs=[
            pl.BlockSpec((TB, IN_PAD), lambda i: (i, 0)),       # batch-tiled x
            pl.BlockSpec((IN_PAD, H_PAD), lambda i: (0, 0)),    # resident W1
            pl.BlockSpec((H_PAD, H_PAD), lambda i: (0, 0)),     # resident W2
            pl.BlockSpec((H_PAD, OUT_PAD), lambda i: (0, 0)),   # resident fused heads
        ],
        out_specs=pl.BlockSpec((TB, OUT_PAD), lambda i: (i, 0)),
        compiler_params=pltpu.CompilerParams(
            dimension_semantics=("parallel",)),
        cost_estimate=pl.CostEstimate(
            flops=flops, transcendentals=0, bytes_accessed=bytes_accessed),
    )(xp, w1p, w2p, whp)

    return out_flat[:B, :out_cols].reshape(B, num_actions, reward_dim)


# ---------------------------------------------------------------------------
# Synthetic parameters (PyTorch nn.Linear shapes, trunk weights pre-transposed)
# ---------------------------------------------------------------------------
def init_params(key, state_dim, num_actions, reward_dim):
    k1, k2, k3, k4, k5, k6 = jax.random.split(key, 6)
    # nn.Linear(state_dim, 64): weight (64, state_dim) -> stored transposed
    w1 = jax.random.normal(k1, (state_dim, HIDDEN), jnp.float32) * 0.1
    b1 = jax.random.normal(k2, (HIDDEN,), jnp.float32) * 0.1
    # nn.Linear(64, 64)
    w2 = jax.random.normal(k3, (HIDDEN, HIDDEN), jnp.float32) * 0.1
    b2 = jax.random.normal(k4, (HIDDEN,), jnp.float32) * 0.1
    # reward_dim heads, each nn.Linear(64, num_actions): per-head (A, 64)
    head_w = jax.random.normal(k5, (reward_dim, num_actions, HIDDEN),
                               jnp.float32) * 0.1
    head_b = jax.random.normal(k6, (reward_dim, num_actions), jnp.float32) * 0.1
    return w1, b1, w2, b2, head_w, head_b


# ---------------------------------------------------------------------------
# References
# ---------------------------------------------------------------------------
def reference_forward_f32(x, w1, b1, w2, b2, head_w, head_b,
                          num_actions, reward_dim):
    """Pure f32 JAX reference mirroring the PyTorch module exactly."""
    h = jnp.maximum(x @ w1 + b1, 0.0)
    h = jnp.maximum(h @ w2 + b2, 0.0)
    q = [h @ head_w[r].T + head_b[r] for r in range(reward_dim)]   # (B, A) each
    q = jnp.stack(q, axis=-1)                                      # (B, A, R)
    return q.reshape(-1, num_actions, reward_dim)


def reference_forward_bf16(x, w1, b1, w2, b2, head_w, head_b,
                           num_actions, reward_dim):
    """Mirror of the kernel's precision: bf16 matmul operands, f32 accumulate."""
    bf = jnp.bfloat16
    f32 = jnp.float32
    h = jnp.dot(x.astype(bf), w1.astype(bf), preferred_element_type=f32)
    h = jnp.maximum(h + b1.astype(bf).astype(f32), 0.0)
    h = jnp.dot(h.astype(bf), w2.astype(bf), preferred_element_type=f32)
    h = jnp.maximum(h + b2.astype(bf).astype(f32), 0.0)
    hb = h.astype(bf)
    q = [jnp.dot(hb, head_w[r].T.astype(bf), preferred_element_type=f32)
         + head_b[r].astype(bf).astype(f32)
         for r in range(reward_dim)]
    q = jnp.stack(q, axis=-1)
    return q.reshape(-1, num_actions, reward_dim)


if __name__ == "__main__":
    state_dim = 16
    num_actions = 4
    reward_dim = 3
    batch = 2

    key = jax.random.PRNGKey(0)
    kx, kp = jax.random.split(key)
    x = jax.random.normal(kx, (batch, state_dim), jnp.float32)

    w1, b1, w2, b2, head_w, head_b = init_params(
        kp, state_dim, num_actions, reward_dim)
    padded_params = build_padded_params(w1, b1, w2, b2, head_w, head_b,
                                        compute_dtype=jnp.bfloat16)

    out = multi_dim_qnetwork_forward(x, padded_params, num_actions, reward_dim)
    out = jax.block_until_ready(out)

    ref_bf16 = reference_forward_bf16(x, w1, b1, w2, b2, head_w, head_b,
                                      num_actions, reward_dim)
    ref_f32 = reference_forward_f32(x, w1, b1, w2, b2, head_w, head_b,
                                    num_actions, reward_dim)

    assert out.shape == (batch, num_actions, reward_dim)
    # Tight check against the precision-matched reference.
    assert jnp.allclose(out, ref_bf16, atol=2e-3, rtol=2e-3), \
        "mismatch vs bf16-mirrored reference"
    # Loose check against the exact (f32) PyTorch-equivalent forward.
    assert jnp.allclose(out, ref_f32, atol=3e-2, rtol=3e-2), \
        "mismatch vs f32 reference"

    print("KERNEL_OK")
</pallas_src>

<mosaic_0001>
module attributes {stable_mosaic.version = 11 : i64} {
  func.func @qnet_kernel(%arg0: i32, %arg1: memref<128x128xbf16, #tpu.memory_space<vmem>>, %arg2: memref<128x128xbf16, #tpu.memory_space<vmem>>, %arg3: memref<128x128xbf16, #tpu.memory_space<vmem>>, %arg4: memref<128x128xbf16, #tpu.memory_space<vmem>>, %arg5: memref<128x128xf32, #tpu.memory_space<vmem>>) attributes {dimension_semantics = [#tpu.dimension_semantics<parallel>], iteration_bounds = array<i64: 1>, scalar_prefetch = 0 : i64, scratch_operands = 0 : i64, tpu.core_type = #tpu.core_type<tc>, window_params = [{transform_indices = @transform_0, window_bounds = array<i64: 128, 128>}, {pipeline_mode = #tpu.pipeline_mode<synchronous>, transform_indices = @transform_1, window_bounds = array<i64: 128, 128>}, {pipeline_mode = #tpu.pipeline_mode<synchronous>, transform_indices = @transform_2, window_bounds = array<i64: 128, 128>}, {pipeline_mode = #tpu.pipeline_mode<synchronous>, transform_indices = @transform_3, window_bounds = array<i64: 128, 128>}, {transform_indices = @transform_4, window_bounds = array<i64: 128, 128>}]} {
    %c0 = arith.constant 0 : index
    %c0_0 = arith.constant 0 : index
    %0 = vector.load %arg1[%c0, %c0_0] : memref<128x128xbf16, #tpu.memory_space<vmem>>, vector<128x128xbf16>
    %c0_1 = arith.constant 0 : index
    %c0_2 = arith.constant 0 : index
    %1 = vector.load %arg2[%c0_1, %c0_2] : memref<128x128xbf16, #tpu.memory_space<vmem>>, vector<128x128xbf16>
    %cst = arith.constant dense<0.000000e+00> : vector<128x128xf32>
    %2 = tpu.matmul %0, %1, %cst {dimension_numbers = #tpu.dot_dimension_numbers<[1], [0], [0], [1], [0, 0, 1, 1], [], []>} : vector<128x128xbf16>, vector<128x128xbf16>, vector<128x128xf32> -> vector<128x128xf32>
    %cst_3 = arith.constant 0.000000e+00 : f32
    %3 = vector.broadcast %cst_3 : f32 to vector<128x128xf32>
    %4 = arith.maximumf %2, %3 : vector<128x128xf32>
    %5 = arith.truncf %4 : vector<128x128xf32> to vector<128x128xbf16>
    %c0_4 = arith.constant 0 : index
    %c0_5 = arith.constant 0 : index
    %6 = vector.load %arg3[%c0_4, %c0_5] : memref<128x128xbf16, #tpu.memory_space<vmem>>, vector<128x128xbf16>
    %cst_6 = arith.constant dense<0.000000e+00> : vector<128x128xf32>
    %7 = tpu.matmul %5, %6, %cst_6 {dimension_numbers = #tpu.dot_dimension_numbers<[1], [0], [0], [1], [0, 0, 1, 1], [], []>} : vector<128x128xbf16>, vector<128x128xbf16>, vector<128x128xf32> -> vector<128x128xf32>
    %cst_7 = arith.constant 0.000000e+00 : f32
    %8 = vector.broadcast %cst_7 : f32 to vector<128x128xf32>
    %9 = arith.maximumf %7, %8 : vector<128x128xf32>
    %10 = arith.truncf %9 : vector<128x128xf32> to vector<128x128xbf16>
    %c0_8 = arith.constant 0 : index
    %c0_9 = arith.constant 0 : index
    %11 = vector.load %arg4[%c0_8, %c0_9] : memref<128x128xbf16, #tpu.memory_space<vmem>>, vector<128x128xbf16>
    %cst_10 = arith.constant dense<0.000000e+00> : vector<128x128xf32>
    %12 = tpu.matmul %10, %11, %cst_10 {dimension_numbers = #tpu.dot_dimension_numbers<[1], [0], [0], [1], [0, 0, 1, 1], [], []>} : vector<128x128xbf16>, vector<128x128xbf16>, vector<128x128xf32> -> vector<128x128xf32>
    %c0_11 = arith.constant 0 : index
    %c0_12 = arith.constant 0 : index
    %13 = vector.load %arg5[%c0_11, %c0_12] : memref<128x128xf32, #tpu.memory_space<vmem>>, vector<128x128xf32>
    tpu.vector_store %arg5[%c0_11, %c0_12], %12 {strides = array<i32>} : memref<128x128xf32, #tpu.memory_space<vmem>>, vector<128x128xf32>,
    return
  }
  func.func @transform_0(%arg0: i32) -> (i32, i32) {
    %c0_i32 = arith.constant 0 : i32
    %c0_i32_0 = arith.constant 0 : i32
    return %arg0, %c0_i32 : i32, i32
  }
  func.func @transform_1(%arg0: i32) -> (i32, i32) {
    %c0_i32 = arith.constant 0 : i32
    %c0_i32_0 = arith.constant 0 : i32
    %c0_i32_1 = arith.constant 0 : i32
    return %c0_i32, %c0_i32_0 : i32, i32
  }
  func.func @transform_2(%arg0: i32) -> (i32, i32) {
    %c0_i32 = arith.constant 0 : i32
    %c0_i32_0 = arith.constant 0 : i32
    %c0_i32_1 = arith.constant 0 : i32
    return %c0_i32, %c0_i32_0 : i32, i32
  }
  func.func @transform_3(%arg0: i32) -> (i32, i32) {
    %c0_i32 = arith.constant 0 : i32
    %c0_i32_0 = arith.constant 0 : i32
    %c0_i32_1 = arith.constant 0 : i32
    return %c0_i32, %c0_i32_0 : i32, i32
  }
  func.func @transform_4(%arg0: i32) -> (i32, i32) {
    %c0_i32 = arith.constant 0 : i32
    %c0_i32_0 = arith.constant 0 : i32
    return %arg0, %c0_i32 : i32, i32
  }
}

</mosaic_0001>

<bundles_post_ra>
// kernel: tpu_custom_call.1
= control target key start
LH: loop header
LB: loop body
LE: loop exit
PB: predicated region body
PF: predicated region fallthrough
CT: control target
= control target key end

     0   :  { %9 = vsyncpa [#allocation3], 0  ;;  %s939_s0 = inlined_call_operand.hbm [shape: bf16[128,128], index: 0, kind: input, shape index: {}]   ;;  %s940_s1 = inlined_call_operand.hbm [shape: bf16[128,128], index: 1, kind: input, shape index: {}]   ;;  %s941_s2 = inlined_call_operand.hbm [shape: bf16[128,128], index: 2, kind: input, shape index: {}]   ;;  %s942_s3 = inlined_call_operand.hbm [shape: bf16[128,128], index: 3, kind: input, shape index: {}]   ;;  %s943_s4 = inlined_call_operand.hbm [shape: f32[128,128], index: 4, kind: output, shape index: {}]  }
   0x1   :  { %10 = vsyncpa [#allocation6], 0 }
   0x2   :  { %11 = vsyncpa [#allocation9], 0 }
   0x3   :  { %12 = vsyncpa [#allocation4], 0  ;;  %s30_s17 = sshll.u32 %s940_s1, 4  ;;  %s890_s18 = smov [#allocation5]   ;;  %s31_s17 = int_to_ptr.hbm [resolvable:$true] %s30_s17 }
   0x4   :  { %s32_s19 = sshll.u32 %s890_s18, 4  ;;  %s17_s22 = sshll.u32 %s939_s0, 4  ;;  %s33_s19 = int_to_ptr.vmem [resolvable:$true] %s32_s19  ;;  %s18_s22 = int_to_ptr.hbm [resolvable:$true] %s17_s22 }
   0x5   :  { %s891_s23 = smov 64   ;;  %s892_s24 = smov 4  }
   0x6   :  { %38 = dma.hbm_to_vmem [thread:$0]  %s31_s17, 1024, %s33_s19, [#allocation6], %s891_s23, %s891_s23, %s892_s24  }
   0x7   :  { %s893_s25 = smov [#allocation2]   ;;  %s43_s29 = sshll.u32 %s941_s2, 4  ;;  %s44_s29 = int_to_ptr.hbm [resolvable:$true] %s43_s29 }
   0x8   :  { %s19_s26 = sshll.u32 %s893_s25, 4  ;;  %s56_s5 = sshll.u32 %s942_s3, 4  ;;  %s20_s26 = int_to_ptr.vmem [resolvable:$true] %s19_s26  ;;  %s57_s5 = int_to_ptr.hbm [resolvable:$true] %s56_s5 }
   0x9   :  { %25 = dma.hbm_to_vmem [thread:$0]  %s18_s22, 1024, %s20_s26, [#allocation3], %s891_s23, %s891_s23, %s892_s24  }
   0xa   :  { %s894_s6 = smov [#allocation7]   ;;  %s895_s0 = smov [#allocation8]  }
   0xb   :  { %s45_s7 = sshll.u32 %s894_s6, 4  ;;  %s58_s8 = sshll.u32 %s895_s0, 4  ;;  %s46_s7 = int_to_ptr.vmem [resolvable:$true] %s45_s7  ;;  %s59_s8 = int_to_ptr.vmem [resolvable:$true] %s58_s8 }
   0xc   :  { %51 = dma.hbm_to_vmem [thread:$0]  %s44_s29, 1024, %s46_s7, [#allocation6], %s891_s23, %s891_s23, %s892_s24  }
   0xd   :  { %64 = dma.hbm_to_vmem [thread:$0]  %s57_s5, 1024, %s59_s8, [#allocation9], %s891_s23, %s891_s23, %s892_s24  }
   0xe   :  { %882 = dma.done.wait [#allocation3], 1024  }
   0xf   :  { %883 = vsyncadd [#allocation3], 4294966272 }
  0x10   :  { %884 = dma.done.wait [#allocation6], 2048  }
  0x11   :  { %885 = vsyncadd [#allocation6], 4294965248 }
  0x12   :  { %886 = dma.done.wait [#allocation9], 1024  }
  0x13   :  { %887 = vsyncadd [#allocation9], 4294966272  ;;  %v712_v0 = vld [vmem:[#allocation5 + $0x38] sm:$0xff]  ;;  %v711_v1 = vld [vmem:[#allocation5 + $0x30] sm:$0xff]  ;;  %s896_s2 = smov [#allocation10]   ;;  %s554_s11 = sshll.u32 %s943_s4, 4  ;;  %s555_s11 = int_to_ptr.hbm [resolvable:$true] %s554_s11 }
  0x14   :  { %209 = vmatpush.bf16.msra.mxu0 %v712_v0  ;;  %729 = vmatpush.bf16.msra.mxu3 %v712_v0  ;;  %v710_v2 = vld [vmem:[#allocation5 + $0x28] sm:$0xff]  ;;  %v709_v3 = vld [vmem:[#allocation5 + $0x20] sm:$0xff]  ;;  %v708_v4 = vld [vmem:[#allocation5 + $0x18] sm:$0xff]  ;;  %s552_s3 = sshll.u32 %s896_s2, 4  ;;  %s897_s12 = smov 128   ;;  %s553_s3 = int_to_ptr.vmem [resolvable:$true] %s552_s3 }
  0x15   :  { %v707_v5 = vld [vmem:[#allocation5 + $0x10] sm:$0xff]  ;;  %v706_v6 = vld [vmem:[#allocation5 + $0x8] sm:$0xff]  ;;  %v705_v7 = vld [vmem:[#allocation5] sm:$0xff]  ;;  %s898_s13 = smov 8  }
  0x16   :  { %v697_v8 = vld [vmem:[#allocation2] sm:$0xff]  ;;  %v703_v9 = vld [vmem:[#allocation2 + $0x30] sm:$0xff]  ;;  %v698_v10 = vld [vmem:[#allocation2 + $0x8] sm:$0xff] }
  0x17   :  { %v704_v11 = vld [vmem:[#allocation2 + $0x38] sm:$0xff]  ;;  %v699_v12 = vld [vmem:[#allocation2 + $0x10] sm:$0xff]  ;;  %v718_v16 = vld [vmem:[#allocation7 + $0x28] sm:$0xff] }
  0x18   :  { %210 = vmatpush.bf16.msra.mxu0 %v711_v1  ;;  %730 = vmatpush.bf16.msra.mxu3 %v711_v1  ;;  %v700_v13 = vld [vmem:[#allocation2 + $0x18] sm:$0xff]  ;;  %v719_v15 = vld [vmem:[#allocation7 + $0x30] sm:$0xff]  ;;  %v717_v17 = vld [vmem:[#allocation7 + $0x20] sm:$0xff] }
  0x19   :  { %v720_v14 = vld [vmem:[#allocation7 + $0x38] sm:$0xff]  ;;  %v701_v18 = vld [vmem:[#allocation2 + $0x20] sm:$0xff]  ;;  %v702_v20 = vld [vmem:[#allocation2 + $0x28] sm:$0xff] }
  0x1a   :  { %346 = vmatpush.bf16.msra.mxu1 %v720_v14  ;;  %v716_v19 = vld [vmem:[#allocation7 + $0x18] sm:$0xff]  ;;  %v715_v21 = vld [vmem:[#allocation7 + $0x10] sm:$0xff]  ;;  %v714_v22 = vld [vmem:[#allocation7 + $0x8] sm:$0xff] }
  0x1b   :  { %v713_v23 = vld [vmem:[#allocation7] sm:$0xff]  ;;  %v728_v54 = vld [vmem:[#allocation8 + $0x38] sm:$0xff]  ;;  %v727_v55 = vld [vmem:[#allocation8 + $0x30] sm:$0xff] }
  0x1c   :  { %211 = vmatpush.bf16.msra.mxu0 %v710_v2  ;;  %731 = vmatpush.bf16.msra.mxu3 %v710_v2  ;;  %v726_v57 = vld [vmem:[#allocation8 + $0x28] sm:$0xff]  ;;  %v725_v58 = vld [vmem:[#allocation8 + $0x20] sm:$0xff]  ;;  %v724_v63 = vld [vmem:[#allocation8 + $0x18] sm:$0xff] }
  0x1d   :  { %483 = vmatpush.bf16.msra.mxu2 %v728_v54 }
  0x1e   :  { %347 = vmatpush.bf16.msra.mxu1 %v719_v15 }
  0x20   :  { %212 = vmatpush.bf16.msra.mxu0 %v709_v3  ;;  %732 = vmatpush.bf16.msra.mxu3 %v709_v3 }
  0x21   :  { %484 = vmatpush.bf16.msra.mxu2 %v727_v55 }
  0x22   :  { %348 = vmatpush.bf16.msra.mxu1 %v718_v16 }
  0x24   :  { %213 = vmatpush.bf16.msra.mxu0 %v708_v4  ;;  %733 = vmatpush.bf16.msra.mxu3 %v708_v4 }
  0x25   :  { %485 = vmatpush.bf16.msra.mxu2 %v726_v57 }
  0x26   :  { %349 = vmatpush.bf16.msra.mxu1 %v717_v17 }
  0x28   :  { %214 = vmatpush.bf16.msra.mxu0 %v707_v5  ;;  %734 = vmatpush.bf16.msra.mxu3 %v707_v5  ;;  %v723_v5 = vld [vmem:[#allocation8 + $0x10] sm:$0xff] }
  0x29   :  { %486 = vmatpush.bf16.msra.mxu2 %v725_v58 }
  0x2a   :  { %350 = vmatpush.bf16.msra.mxu1 %v716_v19 }
  0x2c   :  { %215 = vmatpush.bf16.msra.mxu0 %v706_v6  ;;  %735 = vmatpush.bf16.msra.mxu3 %v706_v6  ;;  %v722_v6 = vld [vmem:[#allocation8 + $0x8] sm:$0xff] }
  0x2d   :  { %487 = vmatpush.bf16.msra.mxu2 %v724_v63 }
  0x2e   :  { %351 = vmatpush.bf16.msra.mxu1 %v715_v21 }
  0x30   :  { %216 = vmatpush.bf16.msra.mxu0 %v705_v7  ;;  %736 = vmatpush.bf16.msra.mxu3 %v705_v7  ;;  %v721_v7 = vld [vmem:[#allocation8] sm:$0xff] }
  0x31   :  { %488 = vmatpush.bf16.msra.mxu2 %v723_v5 }
  0x32   :  { %352 = vmatpush.bf16.msra.mxu1 %v714_v22 }
  0x33   :  { %217 = vmatmul.bf16.vlgmr.msra.gmra.mxu0 %v697_v8  ;;  %247 = vmatmul.bf16.vlgmr.msra.gmra.mxu3 %v703_v9 }
  0x34   :  { %737 = vmatpush.bf16.msrb.mxu3 %v720_v14 }
  0x35   :  { %489 = vmatpush.bf16.msra.mxu2 %v722_v6 }
  0x36   :  { %353 = vmatpush.bf16.msra.mxu1 %v713_v23 }
  0x38   :  { %738 = vmatpush.bf16.msrb.mxu3 %v719_v15 }
  0x39   :  { %490 = vmatpush.bf16.msra.mxu2 %v721_v7 }
  0x3c   :  { %739 = vmatpush.bf16.msrb.mxu3 %v718_v16 }
  0x40   :  { %740 = vmatpush.bf16.msrb.mxu3 %v717_v17 }
  0x43   :  { %222 = vmatmul.bf16.gmra.mxu0 %v698_v10  ;;  %252 = vmatmul.bf16.gmra.mxu3 %v704_v11 }
  0x44   :  { %741 = vmatpush.bf16.msrb.mxu3 %v716_v19 }
  0x48   :  { %742 = vmatpush.bf16.msrb.mxu3 %v715_v21 }
  0x4c   :  { %743 = vmatpush.bf16.msrb.mxu3 %v714_v22 }
  0x50   :  { %744 = vmatpush.bf16.msrb.mxu3 %v713_v23 }
  0x53   :  { %227 = vmatmul.bf16.gmra.mxu0 %v699_v12 }
  0x54   :  { %745 = vmatpush.bf16.msra.mxu3 %v728_v54 }
  0x58   :  { %746 = vmatpush.bf16.msra.mxu3 %v727_v55 }
  0x5c   :  { %747 = vmatpush.bf16.msra.mxu3 %v726_v57 }
  0x60   :  { %748 = vmatpush.bf16.msra.mxu3 %v725_v58 }
  0x63   :  { %232 = vmatmul.bf16.gmra.mxu0 %v700_v13 }
  0x64   :  { %749 = vmatpush.bf16.msra.mxu3 %v724_v63 }
  0x68   :  { %750 = vmatpush.bf16.msra.mxu3 %v723_v5 }
  0x6c   :  { %751 = vmatpush.bf16.msra.mxu3 %v722_v6 }
  0x70   :  { %752 = vmatpush.bf16.msra.mxu3 %v721_v7 }
  0x73   :  { %237 = vmatmul.bf16.gmra.mxu0 %v701_v18 }
  0x83   :  { %242 = vmatmul.bf16.gmra.mxu0 %v702_v20 }
  0xb0   :  { %v218_v24 = vpop.f32.mrf.mxu0 }
  0xb1   :  { %v258_v27 = vmax.f32 %v218_v24, 0.0 }
  0xb6   :  { %v248_v25 = vpop.f32.mrf.mxu3 }
  0xb7   :  { %v270_v30 = vmax.f32 %v248_v25, 0.0 }
  0xb8   :  { %v220_v26 = vpop.f32.mrf.mxu0 }
  0xb9   :  { %v259_v28 = vmax.f32 %v220_v26, 0.0 }
  0xbb   :  { %v274_v29 = vpack.c.bf16 %v259_v28, %v258_v27 }
  0xbd   :  { %354 = vmatmul.bf16.vlgmr.msra.gmra.mxu1 %v274_v29 }
  0xbe   :  { %v250_v31 = vpop.f32.mrf.mxu3 }
  0xbf   :  { %v271_v32 = vmax.f32 %v250_v31, 0.0 }
  0xc0   :  { %v223_v33 = vpop.f32.mrf.mxu0 }
  0xc1   :  { %v280_v34 = vpack.c.bf16 %v271_v32, %v270_v30  ;;  %v260_v37 = vmax.f32 %v223_v33, 0.0 }
  0xc3   :  { %384 = vmatmul.bf16.vlgmr.msrb.gmra.mxu3 %v280_v34 }
  0xc6   :  { %v253_v35 = vpop.f32.mrf.mxu3 }
  0xc7   :  { %v272_v40 = vmax.f32 %v253_v35, 0.0 }
  0xc8   :  { %v225_v36 = vpop.f32.mrf.mxu0 }
  0xc9   :  { %v261_v38 = vmax.f32 %v225_v36, 0.0 }
  0xcb   :  { %v275_v39 = vpack.c.bf16 %v261_v38, %v260_v37 }
  0xcd   :  { %359 = vmatmul.bf16.gmra.mxu1 %v275_v39 }
  0xce   :  { %v255_v41 = vpop.f32.mrf.mxu3 }
  0xcf   :  { %v273_v42 = vmax.f32 %v255_v41, 0.0 }
  0xd0   :  { %v228_v43 = vpop.f32.mrf.mxu0 }
  0xd1   :  { %v281_v44 = vpack.c.bf16 %v273_v42, %v272_v40  ;;  %v262_v46 = vmax.f32 %v228_v43, 0.0 }
  0xd3   :  { %389 = vmatmul.bf16.gmra.mxu3 %v281_v44 }
  0xd8   :  { %v230_v45 = vpop.f32.mrf.mxu0 }
  0xd9   :  { %v263_v47 = vmax.f32 %v230_v45, 0.0 }
  0xdb   :  { %v276_v48 = vpack.c.bf16 %v263_v47, %v262_v46 }
  0xdd   :  { %364 = vmatmul.bf16.gmra.mxu1 %v276_v48 }
  0xe0   :  { %v233_v49 = vpop.f32.mrf.mxu0 }
  0xe1   :  { %v264_v51 = vmax.f32 %v233_v49, 0.0 }
  0xe8   :  { %v235_v50 = vpop.f32.mrf.mxu0 }
  0xe9   :  { %v265_v52 = vmax.f32 %v235_v50, 0.0 }
  0xeb   :  { %v277_v53 = vpack.c.bf16 %v265_v52, %v264_v51 }
  0xed   :  { %369 = vmatmul.bf16.gmra.mxu1 %v277_v53 }
  0xf0   :  { %v238_v56 = vpop.f32.mrf.mxu0 }
  0xf1   :  { %v266_v60 = vmax.f32 %v238_v56, 0.0 }
  0xf8   :  { %v240_v59 = vpop.f32.mrf.mxu0 }
  0xf9   :  { %v267_v61 = vmax.f32 %v240_v59, 0.0 }
  0xfb   :  { %v278_v62 = vpack.c.bf16 %v267_v61, %v266_v60 }
  0xfd   :  { %374 = vmatmul.bf16.gmra.mxu1 %v278_v62 }
 0x100   :  { %v243_v0 = vpop.f32.mrf.mxu0 }
 0x101   :  { %v268_v2 = vmax.f32 %v243_v0, 0.0 }
 0x108   :  { %v245_v1 = vpop.f32.mrf.mxu0 }
 0x109   :  { %v269_v3 = vmax.f32 %v245_v1, 0.0 }
 0x10b   :  { %v279_v4 = vpack.c.bf16 %v269_v3, %v268_v2 }
 0x10d   :  { %379 = vmatmul.bf16.gmra.mxu1 %v279_v4 }
 0x13a   :  { %v355_v8 = vpop.f32.mrf.mxu1 }
 0x13b   :  { %v395_v10 = vmax.f32 %v355_v8, 0.0 }
 0x142   :  { %v357_v9 = vpop.f32.mrf.mxu1 }
 0x143   :  { %v396_v11 = vmax.f32 %v357_v9, 0.0 }
 0x145   :  { %v411_v12 = vpack.c.bf16 %v396_v11, %v395_v10 }
 0x146   :  { %v385_v13 = vpop.f32.mrf.mxu3 }
 0x147   :  { %491 = vmatmul.bf16.vlgmr.msra.gmra.mxu2 %v411_v12  ;;  %v407_v15 = vmax.f32 %v385_v13, 0.0 }
 0x14a   :  { %v360_v14 = vpop.f32.mrf.mxu1 }
 0x14b   :  { %v397_v20 = vmax.f32 %v360_v14, 0.0 }
 0x14e   :  { %v387_v16 = vpop.f32.mrf.mxu3 }
 0x14f   :  { %v408_v17 = vmax.f32 %v387_v16, 0.0 }
 0x151   :  { %v417_v18 = vpack.c.bf16 %v408_v17, %v407_v15 }
 0x152   :  { %v362_v19 = vpop.f32.mrf.mxu1 }
 0x153   :  { %v398_v21 = vmax.f32 %v362_v19, 0.0  ;;  %521 = vmatmul.bf16.vlgmr.msra.gmra.mxu3 %v417_v18 }
 0x155   :  { %v412_v22 = vpack.c.bf16 %v398_v21, %v397_v20 }
 0x156   :  { %v390_v23 = vpop.f32.mrf.mxu3 }
 0x157   :  { %496 = vmatmul.bf16.gmra.mxu2 %v412_v22  ;;  %v409_v25 = vmax.f32 %v390_v23, 0.0 }
 0x15a   :  { %v365_v24 = vpop.f32.mrf.mxu1 }
 0x15b   :  { %v399_v30 = vmax.f32 %v365_v24, 0.0 }
 0x15e   :  { %v392_v26 = vpop.f32.mrf.mxu3 }
 0x15f   :  { %v410_v27 = vmax.f32 %v392_v26, 0.0 }
 0x161   :  { %v418_v28 = vpack.c.bf16 %v410_v27, %v409_v25 }
 0x162   :  { %v367_v29 = vpop.f32.mrf.mxu1 }
 0x163   :  { %v400_v31 = vmax.f32 %v367_v29, 0.0  ;;  %526 = vmatmul.bf16.gmra.mxu3 %v418_v28 }
 0x165   :  { %v413_v32 = vpack.c.bf16 %v400_v31, %v399_v30 }
 0x167   :  { %501 = vmatmul.bf16.gmra.mxu2 %v413_v32 }
 0x16a   :  { %v370_v33 = vpop.f32.mrf.mxu1 }
 0x16b   :  { %v401_v35 = vmax.f32 %v370_v33, 0.0 }
 0x172   :  { %v372_v34 = vpop.f32.mrf.mxu1 }
 0x173   :  { %v402_v36 = vmax.f32 %v372_v34, 0.0 }
 0x175   :  { %v414_v37 = vpack.c.bf16 %v402_v36, %v401_v35 }
 0x177   :  { %506 = vmatmul.bf16.gmra.mxu2 %v414_v37 }
 0x17a   :  { %v375_v38 = vpop.f32.mrf.mxu1 }
 0x17b   :  { %v403_v40 = vmax.f32 %v375_v38, 0.0 }
 0x182   :  { %v377_v39 = vpop.f32.mrf.mxu1 }
 0x183   :  { %v404_v41 = vmax.f32 %v377_v39, 0.0 }
 0x185   :  { %v415_v42 = vpack.c.bf16 %v404_v41, %v403_v40 }
 0x187   :  { %511 = vmatmul.bf16.gmra.mxu2 %v415_v42 }
 0x18a   :  { %v380_v43 = vpop.f32.mrf.mxu1 }
 0x18b   :  { %v405_v45 = vmax.f32 %v380_v43, 0.0 }
 0x192   :  { %v382_v44 = vpop.f32.mrf.mxu1 }
 0x193   :  { %v406_v46 = vmax.f32 %v382_v44, 0.0 }
 0x195   :  { %v416_v47 = vpack.c.bf16 %v406_v46, %v405_v45 }
 0x197   :  { %516 = vmatmul.bf16.gmra.mxu2 %v416_v47 }
 0x1ca   :  { %v492_v48 = vpop.f32.mrf.mxu2 }
 0x1cb   :  { %532 = vst [vmem:[#allocation10] sm:$0xff] %v492_v48 }
 0x1d2   :  { %v494_v49 = vpop.f32.mrf.mxu2 }
 0x1d3   :  { %533 = vst [vmem:[#allocation10 + $0x8] sm:$0xff] %v494_v49 }
 0x1d6   :  { %v522_v50 = vpop.f32.mrf.mxu3 }
 0x1d7   :  { %544 = vst [vmem:[#allocation10 + $0x60] sm:$0xff] %v522_v50 }
 0x1da   :  { %v497_v51 = vpop.f32.mrf.mxu2 }
 0x1db   :  { %534 = vst [vmem:[#allocation10 + $0x10] sm:$0xff] %v497_v51 }
 0x1de   :  { %v524_v52 = vpop.f32.mrf.mxu3 }
 0x1df   :  { %545 = vst [vmem:[#allocation10 + $0x68] sm:$0xff] %v524_v52 }
 0x1e2   :  { %v499_v53 = vpop.f32.mrf.mxu2 }
 0x1e3   :  { %535 = vst [vmem:[#allocation10 + $0x18] sm:$0xff] %v499_v53 }
 0x1e6   :  { %v527_v54 = vpop.f32.mrf.mxu3 }
 0x1e7   :  { %546 = vst [vmem:[#allocation10 + $0x70] sm:$0xff] %v527_v54 }
 0x1ea   :  { %v502_v55 = vpop.f32.mrf.mxu2 }
 0x1eb   :  { %536 = vst [vmem:[#allocation10 + $0x20] sm:$0xff] %v502_v55 }
 0x1ee   :  { %v529_v56 = vpop.f32.mrf.mxu3 }
 0x1ef   :  { %547 = vst [vmem:[#allocation10 + $0x78] sm:$0xff] %v529_v56 }
 0x1f2   :  { %v504_v57 = vpop.f32.mrf.mxu2 }
 0x1f3   :  { %537 = vst [vmem:[#allocation10 + $0x28] sm:$0xff] %v504_v57 }
 0x1fa   :  { %v507_v58 = vpop.f32.mrf.mxu2 }
 0x1fb   :  { %538 = vst [vmem:[#allocation10 + $0x30] sm:$0xff] %v507_v58 }
 0x202   :  { %v509_v59 = vpop.f32.mrf.mxu2 }
 0x203   :  { %539 = vst [vmem:[#allocation10 + $0x38] sm:$0xff] %v509_v59 }
 0x20a   :  { %v512_v60 = vpop.f32.mrf.mxu2 }
 0x20b   :  { %540 = vst [vmem:[#allocation10 + $0x40] sm:$0xff] %v512_v60 }
 0x212   :  { %v514_v61 = vpop.f32.mrf.mxu2 }
 0x213   :  { %541 = vst [vmem:[#allocation10 + $0x48] sm:$0xff] %v514_v61 }
 0x21a   :  { %v517_v62 = vpop.f32.mrf.mxu2 }
 0x21b   :  { %542 = vst [vmem:[#allocation10 + $0x50] sm:$0xff] %v517_v62 }
 0x222   :  { %v519_v63 = vpop.f32.mrf.mxu2 }
 0x223   :  { %543 = vst [vmem:[#allocation10 + $0x58] sm:$0xff] %v519_v63 }
 0x224   :  { %560 = dma.vmem_to_hbm [thread:$0]  %s553_s3, 2048, %s555_s11, [#allocation4], %s897_s12, %s897_s12, %s898_s13  }
 0x225   :  { %888 = dma.done.wait [#allocation4], 2048  }
 0x226   :  { %889 = vsyncadd [#allocation4], 4294965248 }
 0x227   :  { %565 = vsyncpa [#allocation3], 1 }
 0x228   :  { %566 = vsyncpa [#allocation6], 1 }
 0x229   :  { %567 = vsyncpa [#allocation9], 1 }
 0x22a   :  { %568 = vsyncpa [#allocation4], 1 }

</bundles_post_ra>
